<compile_context>
chip_gen: v7x
topology: tpu7x:2x2x1
jax: 0.10.0
libtpu: 0.0.40
codegen_flags: <defaults>
</compile_context>

<pallas_src>
import jax
import jax.numpy as jnp
from jax.experimental import pallas as pl
from jax.experimental.pallas import tpu as pltpu

_SUB = 2048                      # pixels per in-kernel chunk (keeps f32 temps ~1 MiB)
_VMEM_LIMIT = 48 * 1024 * 1024   # > 16/32 MiB scoped defaults, < v7x 64 MiB physical


def _compute_dtype(in_dtype):
    """Dtype used for the in-kernel transpose (always exact for the module semantics)."""
    if in_dtype.itemsize >= 4:
        return None                      # transpose in the native 32-bit dtype
    if in_dtype == jnp.uint8:
        return jnp.float32               # 0..255 exact in f32; output is f32 anyway
    if jnp.issubdtype(in_dtype, jnp.integer):
        return jnp.int32                 # exact widening; cast back on store
    return jnp.float32                   # (b)f16 -> f32 exact; cast back on store


def _make_hwc_to_chw_kernel(blk, cast_dtype):
    # Static chunk schedule: offsets/lengths are compile-time constants, so every
    # load/store is a static slice; chunk starts are multiples of 2048 (lane aligned).
    bounds = [(lo, min(_SUB, blk - lo)) for lo in range(0, blk, _SUB)]

    def kernel(x_ref, o_ref):
        # x_ref: (blk, C) pixel block (input dtype); o_ref: (C, blk) block (out dtype)
        for lo, ln in bounds:
            chunk = x_ref[lo:lo + ln, :]
            if cast_dtype is not None:
                chunk = chunk.astype(cast_dtype)
            o_ref[:, lo:lo + ln] = jnp.transpose(chunk, (1, 0)).astype(o_ref.dtype)

    return kernel


def _cast_kernel(x_ref, o_ref):
    o_ref[...] = x_ref[...].astype(o_ref.dtype)


def _cast_2d_to_f32(x):
    """Row-tiled, pipelined uint8 -> float32 cast of a 2-D [H, W] image (C == 1 path)."""
    H, W = x.shape
    bh = H if H <= 256 else 256          # MBs per step for real images; amortizes grid overhead
    return pl.pallas_call(
        _cast_kernel,
        out_shape=jax.ShapeDtypeStruct((H, W), jnp.float32),
        grid=(pl.cdiv(H, bh),),
        in_specs=[pl.BlockSpec((bh, W), lambda i: (i, 0))],
        out_specs=pl.BlockSpec((bh, W), lambda i: (i, 0)),
        compiler_params=pltpu.CompilerParams(
            dimension_semantics=("parallel",),
            vmem_limit_bytes=_VMEM_LIMIT),
        cost_estimate=pl.CostEstimate(
            flops=0, transcendentals=0,
            bytes_accessed=H * W * (x.dtype.itemsize + 4)),  # output is float32
    )(x)


def to_only_tensor(pic):
    """JAX/Pallas equivalent of ToOnlyTensor.forward for ndarray inputs.

    pic: [H, W, C] or [H, W] array (HWC image convention).
    returns: [C, H, W]; uint8 ("ByteTensor") inputs are cast to float32
             (cast only -- NO /255 scaling); other dtypes pass through unchanged.
    """
    pic = jnp.asarray(pic)
    if pic.ndim == 2:                    # pic[:, :, None] branch of the module
        pic = pic[:, :, None]
    H, W, C = pic.shape
    is_byte = pic.dtype == jnp.uint8
    out_dtype = jnp.float32 if is_byte else pic.dtype

    # ---- short-circuits: C == 1 needs no transpose at all --------------------------
    if C == 1:
        if not is_byte:
            return pic.reshape(1, H, W)                  # identity: skip kernel entirely
        return _cast_2d_to_f32(pic.reshape(H, W)).reshape(1, H, W)

    hw = H * W
    in_itemsize = pic.dtype.itemsize
    out_itemsize = 4 if is_byte else pic.dtype.itemsize

    # ---- pick the pixel block so the (tiled) VMEM working set stays small ----------
    # Input (blk, C) blocks are lane-sparse in VMEM (~128*itemsize B/pixel), so cap the
    # per-buffer footprint at ~4 MiB; also cap the (C, blk) output block at ~4 MiB.
    budget = 32768 // in_itemsize
    budget = min(budget, max(256, ((4 * 1024 * 1024) // (C * out_itemsize)) // 256 * 256))
    blk = hw if hw <= budget else budget                 # multiple of 256 whenever grid > 1

    x2d = pic.reshape(hw, C)             # contiguous row-major view, no data reorder

    out2d = pl.pallas_call(
        _make_hwc_to_chw_kernel(blk, _compute_dtype(pic.dtype)),
        out_shape=jax.ShapeDtypeStruct((C, hw), out_dtype),
        grid=(pl.cdiv(hw, blk),),
        in_specs=[pl.BlockSpec((blk, C), lambda i: (i, 0))],
        out_specs=pl.BlockSpec((C, blk), lambda i: (0, i)),
        compiler_params=pltpu.CompilerParams(
            dimension_semantics=("parallel",),           # v7x: shard pixel blocks over both TCs
            vmem_limit_bytes=_VMEM_LIMIT),
        cost_estimate=pl.CostEstimate(
            flops=0, transcendentals=0,
            bytes_accessed=hw * C * (in_itemsize + out_itemsize)),
    )(x2d)
    return out2d.reshape(C, H, W)


# TODO(synk): PIL-only branches (accimage path, mode '1' -> 255*img, mode->nptype table)
# have no array-kernel equivalent; only the numpy-ndarray path is implemented.

if __name__ == "__main__":
    key = jax.random.PRNGKey(0)

    # ByteTensor path: HWC uint8 RGBA image -> CHW float32 (cast only, no scaling)
    H, W, C = 16, 16, 4
    pic_u8 = jax.random.randint(key, (H, W, C), 0, 256, dtype=jnp.int32).astype(jnp.uint8)
    out = jax.block_until_ready(to_only_tensor(pic_u8))
    ref = jnp.transpose(pic_u8, (2, 0, 1)).astype(jnp.float32)
    assert out.shape == (C, H, W) and out.dtype == jnp.float32
    assert bool(jnp.all(out == ref))

    # RGB (C=3), the common image case
    k2 = jax.random.fold_in(key, 1)
    pic_rgb = jax.random.randint(k2, (16, 16, 3), 0, 256, dtype=jnp.int32).astype(jnp.uint8)
    out3 = jax.block_until_ready(to_only_tensor(pic_rgb))
    ref3 = jnp.transpose(pic_rgb, (2, 0, 1)).astype(jnp.float32)
    assert out3.shape == (3, 16, 16) and out3.dtype == jnp.float32
    assert bool(jnp.all(out3 == ref3))

    # non-byte HWC path: dtype passes through unchanged, transpose only
    k3 = jax.random.fold_in(key, 2)
    pic_f = jax.random.uniform(k3, (16, 16, 4), dtype=jnp.float32)
    outf = jax.block_until_ready(to_only_tensor(pic_f))
    assert outf.dtype == jnp.float32
    assert bool(jnp.all(outf == jnp.transpose(pic_f, (2, 0, 1))))

    # 2-D grayscale uint8 -> (1, H, W) float32 via the cast-only kernel
    k4 = jax.random.fold_in(key, 3)
    pic_g = jax.random.randint(k4, (16, 16), 0, 256, dtype=jnp.int32).astype(jnp.uint8)
    outg = jax.block_until_ready(to_only_tensor(pic_g))
    assert outg.shape == (1, 16, 16) and outg.dtype == jnp.float32
    assert bool(jnp.all(outg[0] == pic_g.astype(jnp.float32)))

    # 2-D non-byte path: pure identity reshape (no kernel launch)
    pic_f2 = jax.random.uniform(key, (16, 16), dtype=jnp.float32)
    outf2 = jax.block_until_ready(to_only_tensor(pic_f2))
    assert outf2.shape == (1, 16, 16) and outf2.dtype == jnp.float32
    assert bool(jnp.all(outf2[0] == pic_f2))

    print("KERNEL_OK")
</pallas_src>

<mosaic_0001>
module attributes {stable_mosaic.version = 11 : i64} {
  func.func @kernel(%arg0: i32, %arg1: memref<256x4xi8, #tpu.memory_space<vmem>>, %arg2: memref<4x256xf32, #tpu.memory_space<vmem>>) attributes {dimension_semantics = [#tpu.dimension_semantics<parallel>], iteration_bounds = array<i64: 1>, scalar_prefetch = 0 : i64, scratch_operands = 0 : i64, tpu.core_type = #tpu.core_type<tc>, window_params = [{transform_indices = @transform_0, window_bounds = array<i64: 256, 4>}, {transform_indices = @transform_1, window_bounds = array<i64: 4, 256>}]} {
    %c0 = arith.constant 0 : index
    %c0_0 = arith.constant 0 : index
    %0 = vector.load %arg1[%c0, %c0_0] : memref<256x4xi8, #tpu.memory_space<vmem>>, vector<256x4xi8>
    %1 = arith.uitofp %0 : vector<256x4xi8> to vector<256x4xf32>
    %2 = tpu.transpose %1, [1, 0] : vector<256x4xf32> -> vector<4x256xf32>
    %c0_1 = arith.constant 0 : index
    %c0_2 = arith.constant 0 : index
    %3 = vector.load %arg2[%c0_1, %c0_2] : memref<4x256xf32, #tpu.memory_space<vmem>>, vector<4x256xf32>
    tpu.vector_store %arg2[%c0_1, %c0_2], %2 {strides = array<i32>} : memref<4x256xf32, #tpu.memory_space<vmem>>, vector<4x256xf32>,
    return
  }
  func.func @transform_0(%arg0: i32) -> (i32, i32) {
    %c0_i32 = arith.constant 0 : i32
    %c0_i32_0 = arith.constant 0 : i32
    return %arg0, %c0_i32 : i32, i32
  }
  func.func @transform_1(%arg0: i32) -> (i32, i32) {
    %c0_i32 = arith.constant 0 : i32
    %c0_i32_0 = arith.constant 0 : i32
    return %c0_i32, %arg0 : i32, i32
  }
}

</mosaic_0001>

<bundles_post_ra>
// kernel: tpu_custom_call.1
= control target key start
LH: loop header
LB: loop body
LE: loop exit
PB: predicated region body
PF: predicated region fallthrough
CT: control target
= control target key end

     0   :  { %s371_s0 = inlined_call_operand.vmem [shape: u8[256,4], index: 0, kind: input, shape index: {}]   ;;  %s372_s1 = inlined_call_operand.hbm [shape: f32[4,256], index: 1, kind: output, shape index: {}]  }
   0x1   :  { %v291_v0 = vld [vmem:[%s371_s0 + $0x20] sm:$0xff]  }
   0x2   :  { %v221_v1 = vld [vmem:[%s371_s0] sm:$0xff]   ;;  %v254_v2 = vunpack.c.0.s8 %v291_v0  ;;  %v255_v4 = vunpack.c.1.s8 %v291_v0  ;;  %v258_v6 = vunpack.c.2.s8 %v291_v0 }
   0x3   :  { %v222_v3 = vunpack.c.0.s8 %v221_v1  ;;  %v223_v5 = vunpack.c.1.s8 %v221_v1  ;;  %v226_v7 = vunpack.c.2.s8 %v221_v1 }
   0x4   :  { %6 = vsyncpa [#allocation3], 0  ;;  %v89_v8 = vand.u32 255, %v254_v2  ;;  %v90_v10 = vand.u32 255, %v255_v4  ;;  %v259_v14 = vunpack.c.3.s8 %v291_v0  ;;  %v227_v15 = vunpack.c.3.s8 %v221_v1  ;;  %v293_v20 = vld [vmem:[%s371_s0 + $0x28] sm:$0xff]   ;;  %v295_v46 = vld [vmem:[%s371_s0 + $0x30] sm:$0xff]  }
   0x5   :  { %v73_v9 = vand.u32 255, %v222_v3  ;;  %v74_v11 = vand.u32 255, %v223_v5  ;;  %v91_v18 = vand.u32 255, %v258_v6  ;;  %v75_v19 = vand.u32 255, %v226_v7  ;;  %v285_v21 = vld [vmem:[%s371_s0 + $0x8] sm:$0xff]   ;;  %v287_v47 = vld [vmem:[%s371_s0 + $0x10] sm:$0xff]  }
   0x6   :  { %v121_v12 = vcvt.s32.f32 %v89_v8  ;;  %v122_v16 = vcvt.s32.f32 %v90_v10  ;;  %v92_v22 = vand.u32 255, %v259_v14  ;;  %v76_v23 = vand.u32 255, %v227_v15  ;;  %v297_v8 = vld [vmem:[%s371_s0 + $0x38] sm:$0xff]  }
   0x7   :  { %v105_v13 = vcvt.s32.f32 %v73_v9  ;;  %v106_v17 = vcvt.s32.f32 %v74_v11  ;;  %v123_v24 = vcvt.s32.f32 %v91_v18  ;;  %v107_v25 = vcvt.s32.f32 %v75_v19  ;;  %v289_v9 = vld [vmem:[%s371_s0 + $0x18] sm:$0xff]   ;;  %s324_s0 = smov [#allocation2]  }
   0x8   :  { %169 = vxpose.xlu1.b32.start [1/16] (narrow) %v121_v12, 8  ;;  %v262_v26 = vunpack.c.0.s8 %v293_v20  ;;  %v230_v27 = vunpack.c.0.s8 %v285_v21  ;;  %v124_v28 = vcvt.s32.f32 %v92_v22  ;;  %v108_v29 = vcvt.s32.f32 %v76_v23  ;;  %s212_s22 = sshll.u32 %s324_s0, 4  ;;  %s213_s22 = int_to_ptr.vmem [resolvable:$true] %s212_s22 }
   0x9   :  { %137 = vxpose.xlu0.b32.start [1/16] (narrow) %v105_v13, 8  ;;  %v263_v32 = vunpack.c.1.s8 %v293_v20  ;;  %v231_v33 = vunpack.c.1.s8 %v285_v21  ;;  %v266_v34 = vunpack.c.2.s8 %v293_v20  ;;  %v234_v35 = vunpack.c.2.s8 %v285_v21  ;;  %s300_s23 = scalar_lea.vmem %s213_s22, 128  ;;  %p305_p1 = scmp.lt.s32.totalorder %s213_s22, %s213_s22 }
   0xa   :  { %v93_v30 = vand.u32 255, %v262_v26  ;;  %v77_v31 = vand.u32 255, %v230_v27  ;;  %v267_v40 = vunpack.c.3.s8 %v293_v20  ;;  %v235_v41 = vunpack.c.3.s8 %v285_v21  ;;  %p301_p0 = scmp.ne.s32.totalorder %s213_s22, %s300_s23  ;;  %p306_p2 = scmp.lt.s32.totalorder %s300_s23, %s300_s23 }
   0xb   :  { %v94_v38 = vand.u32 255, %v263_v32  ;;  %v78_v39 = vand.u32 255, %v231_v33  ;;  %v95_v44 = vand.u32 255, %v266_v34  ;;  %v79_v45 = vand.u32 255, %v234_v35 }
   0xc   :  { %170 = vxpose.xlu1.b32.cont [2/16] (narrow) %v122_v16, 8  ;;  %v125_v36 = vcvt.s32.f32 %v93_v30  ;;  %v109_v37 = vcvt.s32.f32 %v77_v31  ;;  %v96_v48 = vand.u32 255, %v267_v40  ;;  %v80_v49 = vand.u32 255, %v235_v41  ;;  %p307_p3 = por %p306_p2, %p305_p1 }
   0xd   :  { %138 = vxpose.xlu0.b32.cont [2/16] (narrow) %v106_v17, 8  ;;  %v126_v42 = vcvt.s32.f32 %v94_v38  ;;  %v110_v43 = vcvt.s32.f32 %v78_v39  ;;  %v127_v50 = vcvt.s32.f32 %v95_v44  ;;  %v111_v51 = vcvt.s32.f32 %v79_v45 }
   0xe   :  { %v270_v52 = vunpack.c.0.s8 %v295_v46  ;;  %v238_v53 = vunpack.c.0.s8 %v287_v47  ;;  %v128_v54 = vcvt.s32.f32 %v96_v48  ;;  %v112_v55 = vcvt.s32.f32 %v80_v49  ;;  %p308_p4 = pnand %p307_p3, %p301_p0 }
   0xf   :  { %v271_v58 = vunpack.c.1.s8 %v295_v46  ;;  %v239_v59 = vunpack.c.1.s8 %v287_v47  ;;  %v274_v60 = vunpack.c.2.s8 %v295_v46  ;;  %v242_v61 = vunpack.c.2.s8 %v287_v47 }
  0x10   :  { %171 = vxpose.xlu1.b32.cont [3/16] (narrow) %v123_v24, 8  ;;  %v97_v56 = vand.u32 255, %v270_v52  ;;  %v81_v57 = vand.u32 255, %v238_v53  ;;  %v275_v2 = vunpack.c.3.s8 %v295_v46  ;;  %v243_v3 = vunpack.c.3.s8 %v287_v47 }
  0x11   :  { %139 = vxpose.xlu0.b32.cont [3/16] (narrow) %v107_v25, 8  ;;  %v98_v0 = vand.u32 255, %v271_v58  ;;  %v82_v1 = vand.u32 255, %v239_v59  ;;  %v99_v6 = vand.u32 255, %v274_v60  ;;  %v83_v7 = vand.u32 255, %v242_v61 }
  0x12   :  { %v129_v62 = vcvt.s32.f32 %v97_v56  ;;  %v113_v63 = vcvt.s32.f32 %v81_v57  ;;  %v100_v10 = vand.u32 255, %v275_v2  ;;  %v84_v11 = vand.u32 255, %v243_v3 }
  0x13   :  { %v130_v4 = vcvt.s32.f32 %v98_v0  ;;  %v114_v5 = vcvt.s32.f32 %v82_v1  ;;  %v131_v12 = vcvt.s32.f32 %v99_v6  ;;  %v115_v13 = vcvt.s32.f32 %v83_v7 }
  0x14   :  { %172 = vxpose.xlu1.b32.cont [4/16] (narrow) %v124_v28, 8  ;;  %v278_v14 = vunpack.c.0.s8 %v297_v8  ;;  %v246_v15 = vunpack.c.0.s8 %v289_v9  ;;  %v132_v16 = vcvt.s32.f32 %v100_v10  ;;  %v116_v17 = vcvt.s32.f32 %v84_v11 }
  0x15   :  { %140 = vxpose.xlu0.b32.cont [4/16] (narrow) %v108_v29, 8  ;;  %v279_v20 = vunpack.c.1.s8 %v297_v8  ;;  %v247_v21 = vunpack.c.1.s8 %v289_v9  ;;  %v282_v22 = vunpack.c.2.s8 %v297_v8  ;;  %v250_v23 = vunpack.c.2.s8 %v289_v9 }
  0x16   :  { %v101_v18 = vand.u32 255, %v278_v14  ;;  %v85_v19 = vand.u32 255, %v246_v15  ;;  %v283_v28 = vunpack.c.3.s8 %v297_v8  ;;  %v251_v29 = vunpack.c.3.s8 %v289_v9 }
  0x17   :  { %v102_v26 = vand.u32 255, %v279_v20  ;;  %v86_v27 = vand.u32 255, %v247_v21  ;;  %v103_v32 = vand.u32 255, %v282_v22  ;;  %v87_v33 = vand.u32 255, %v250_v23 }
  0x18   :  { %173 = vxpose.xlu1.b32.cont [5/16] (narrow) %v125_v36, 8  ;;  %v133_v24 = vcvt.s32.f32 %v101_v18  ;;  %v117_v25 = vcvt.s32.f32 %v85_v19  ;;  %v104_v36 = vand.u32 255, %v283_v28 }
  0x19   :  { %141 = vxpose.xlu0.b32.cont [5/16] (narrow) %v109_v37, 8  ;;  %v134_v30 = vcvt.s32.f32 %v102_v26  ;;  %v118_v31 = vcvt.s32.f32 %v86_v27  ;;  %v135_v34 = vcvt.s32.f32 %v103_v32  ;;  %v119_v35 = vcvt.s32.f32 %v87_v33 }
  0x1a   :  { %v88_v37 = vand.u32 255, %v251_v29  ;;  %v136_v38 = vcvt.s32.f32 %v104_v36 }
  0x1c   :  { %174 = vxpose.xlu1.b32.cont [6/16] (narrow) %v126_v42, 8  ;;  %v120_v39 = vcvt.s32.f32 %v88_v37 }
  0x1d   :  { %142 = vxpose.xlu0.b32.cont [6/16] (narrow) %v110_v43, 8 }
  0x20   :  { %175 = vxpose.xlu1.b32.cont [7/16] (narrow) %v127_v50, 8 }
  0x21   :  { %143 = vxpose.xlu0.b32.cont [7/16] (narrow) %v111_v51, 8 }
  0x24   :  { %176 = vxpose.xlu1.b32.cont [8/16] (narrow) %v128_v54, 8 }
  0x25   :  { %144 = vxpose.xlu0.b32.cont [8/16] (narrow) %v112_v55, 8 }
  0x28   :  { %177 = vxpose.xlu1.b32.cont [9/16] (narrow) %v129_v62, 8 }
  0x29   :  { %145 = vxpose.xlu0.b32.cont [9/16] (narrow) %v113_v63, 8 }
  0x2c   :  { %178 = vxpose.xlu1.b32.cont [10/16] (narrow) %v130_v4, 8 }
  0x2d   :  { %146 = vxpose.xlu0.b32.cont [10/16] (narrow) %v114_v5, 8 }
  0x30   :  { %179 = vxpose.xlu1.b32.cont [11/16] (narrow) %v131_v12, 8 }
  0x31   :  { %147 = vxpose.xlu0.b32.cont [11/16] (narrow) %v115_v13, 8 }
  0x34   :  { %180 = vxpose.xlu1.b32.cont [12/16] (narrow) %v132_v16, 8 }
  0x35   :  { %148 = vxpose.xlu0.b32.cont [12/16] (narrow) %v116_v17, 8 }
  0x38   :  { %181 = vxpose.xlu1.b32.cont [13/16] (narrow) %v133_v24, 8 }
  0x39   :  { %149 = vxpose.xlu0.b32.cont [13/16] (narrow) %v117_v25, 8 }
  0x3c   :  { %182 = vxpose.xlu1.b32.cont [14/16] (narrow) %v134_v30, 8 }
  0x3d   :  { %150 = vxpose.xlu0.b32.cont [14/16] (narrow) %v118_v31, 8 }
  0x40   :  { %183 = vxpose.xlu1.b32.cont [15/16] (narrow) %v135_v34, 8 }
  0x41   :  { %151 = vxpose.xlu0.b32.cont [15/16] (narrow) %v119_v35, 8 }
  0x44   :  { %184 = vxpose.xlu1.b32.end [16/16] (narrow) %v136_v38, 8 }
  0x45   :  { %152 = vxpose.xlu0.b32.end [16/16] (narrow) %v120_v39, 8 }
  0x88   :  { %v185_v40 = vpop.trf.xlu1 }
  0x89   :  { %v153_v41 = vpop.trf.xlu0 }
  0x8a   :  { %v203_v42 = vcombine.low %v153_v41, %v185_v40 }
  0x8c   :  { %205 = vst [vmem:[#allocation2] sm:$0xff] %v203_v42 }
  0x8d   :  { %311 = shalt.err (!%p308_p4)
}
  0x8e   :  { %s312_s26 = scalar_lea.hbm %s372_s1, 128 }
  0x8f   :  { %p313_p5 = scmp.ne.s32.totalorder %s372_s1, %s312_s26  ;;  %p316_p6 = scmp.lt.u32.totalorder %s312_s26, %s372_s1 }
  0x91   :  { %p318_p7 = pnand %p316_p6, %p313_p5 }
  0x93   :  { %321 = shalt.err (!%p318_p7)
}
  0x94   :  { %215 = dma.vmem_to_hbm [thread:$0]  %s213_s22, 128, %s372_s1, [#allocation3]  }
  0x95   :  { %322 = dma.done.wait [#allocation3], 128  }
  0x96   :  { %323 = vsyncadd [#allocation3], 4294967168 }
  0x97   :  { %219 = vsyncpa [#allocation3], 1 }

</bundles_post_ra>
